<compile_context>
chip_gen: v7x
topology: tpu7x:2x2x1
jax: 0.10.0
libtpu: 0.0.40
codegen_flags: <defaults>
</compile_context>

<pallas_src>
import functools

import jax
import jax.numpy as jnp
from jax.experimental import pallas as pl
from jax.experimental.pallas import tpu as pltpu

_EPS = 1e-8


def _dist_kernel(ys_ref, yt_ref, out_ref,
                 inter_acc, sx_acc, st_acc, sxx_acc, stt_acc, sxt_acc,
                 *, T, C, P, TP, needs_mask):
    pc = pl.program_id(1)
    npc = pl.num_programs(1)

    # Per-image reduction: reset accumulators at the first pixel chunk of every
    # image.  (The batch axis is "parallel" with per-image output blocks, so no
    # state may carry across images -- this also makes the kernel race-free when
    # the batch axis is sharded across v7x's two TensorCores.)
    @pl.when(pc == 0)
    def _init():
        inter_acc[...] = jnp.zeros_like(inter_acc)
        sx_acc[...] = jnp.zeros_like(sx_acc)
        st_acc[...] = jnp.zeros_like(st_acc)
        sxx_acc[...] = jnp.zeros_like(sxx_acc)
        stt_acc[...] = jnp.zeros_like(stt_acc)
        sxt_acc[...] = jnp.zeros_like(sxt_acc)

    # ---- load (C, TP) tile: classes on sublanes, pixels on lanes -------------
    ys = ys_ref[0].astype(jnp.float32)
    yt = yt_ref[0].astype(jnp.float32)
    if T != 1.0:                       # statically skipped for the default T==1
        inv_t = jnp.float32(1.0 / T)
        ys = ys * inv_t
        yt = yt * inv_t

    if needs_mask:
        # Only compiled in when P % TP != 0.  Zeroed logits give a uniform
        # softmax -> centered values are exactly 0, so the masked tail columns
        # contribute nothing to either loss without any further masking.
        lane = jax.lax.broadcasted_iota(jnp.int32, (1, TP), 1)
        valid = (pc * TP + lane) < P
        ys = jnp.where(valid, ys, 0.0)
        yt = jnp.where(valid, yt, 0.0)

    # ---- softmax over classes (sublane axis), numerically stable -------------
    # max() reductions stay on the XLU; all sublane SUMs go to the idle MXU.
    ys = ys - jnp.max(ys, axis=0, keepdims=True)
    yt = yt - jnp.max(yt, axis=0, keepdims=True)
    es = jnp.exp(ys)
    et = jnp.exp(yt)

    ones_row = jnp.ones((1, C), jnp.float32)
    hp = jax.lax.Precision.HIGHEST     # keep ~f32 accuracy on the MXU

    def row_sum(x):                    # sum over classes via ones-row matmul
        return jnp.dot(ones_row, x, precision=hp,
                       preferred_element_type=jnp.float32)

    p_s = es * (1.0 / row_sum(es))
    p_t = et * (1.0 / row_sum(et))

    # softmax rows sum to 1 => per-pixel class mean is exactly 1/C.
    inv_c = jnp.float32(1.0 / C)
    xs = p_s - inv_c
    xt = p_t - inv_c
    pxx = xs * xs
    ptt = xt * xt
    pxt = xs * xt

    # ---- inter-class: Pearson over classes, one value per pixel (lane) -------
    num = row_sum(pxt)                                 # (1, TP)
    ss = row_sum(pxx)
    tt = row_sum(ptt)
    corr = num * jax.lax.rsqrt(ss * tt + 1e-16)        # rsqrt -> EUP slot
    inter_acc[...] += corr             # masked tail columns are exactly 0

    # ---- intra-class: accumulate per-class column moments --------------------
    sx_acc[...] += xs
    st_acc[...] += xt
    sxx_acc[...] += pxx
    stt_acc[...] += ptt
    sxt_acc[...] += pxt

    # ---- finalize: emit this image's partial sums on the last pixel chunk ----
    @pl.when(pc == npc - 1)
    def _finalize():
        sx = jnp.sum(sx_acc[...], axis=1, keepdims=True)       # (C, 1)
        st = jnp.sum(st_acc[...], axis=1, keepdims=True)
        sxx = jnp.sum(sxx_acc[...], axis=1, keepdims=True)
        stt = jnp.sum(stt_acc[...], axis=1, keepdims=True)
        sxt = jnp.sum(sxt_acc[...], axis=1, keepdims=True)
        inter = jnp.sum(inter_acc[...], axis=1, keepdims=True)  # (1, 1)
        inter_col = jnp.broadcast_to(inter, (C, 1))
        pad = jnp.zeros((C, 2), jnp.float32)
        out_ref[0, :, :] = jnp.concatenate(
            [sx, st, sxx, stt, sxt, inter_col, pad], axis=1)    # (C, 8)


def _choose_pixel_tile(P, C, target_bytes=2 << 20):
    """Largest lane tile whose padded (C, TP) f32 slab is ~target_bytes.

    Prefers a multiple-of-128 divisor of P so the tail mask is statically
    elided; falls back to the full extent (always layout-legal) for small P.
    """
    c_pad = -(-C // 8) * 8
    target = max(128, (target_bytes // (4 * c_pad)) // 128 * 128)
    if P <= target:
        return P                       # full-extent block: no mask needed
    tp = target
    while tp >= 128:
        if P % tp == 0:
            return tp                  # divides P: tail mask statically elided
        tp -= 128
    return target                      # no nice divisor: masked tail path


def dist_loss(y_s, y_t, target, *, beta=1.0, gamma=1.0, T=1.0):
    """DIST.forward: y_s, y_t are NCHW logits; target only supplies (H, W) for
    the resize_out=True path (disabled by default) and is unused."""
    assert y_s.ndim == 4
    B, C, h, w = y_s.shape
    del target  # only needed when resize_out=True (bilinear resize)

    P = h * w
    N = B * P
    # Contiguous reshape only (no NCHW->NHWC transpose).
    ys3 = y_s.reshape(B, C, P)
    yt3 = y_t.reshape(B, C, P)

    # Small-P path (h*w < 128): fold batch into the lane axis so vregs stay
    # full; the tiny transpose is negligible at these sizes.
    if P < 128 and B > 1:
        ys3 = jnp.transpose(ys3, (1, 0, 2)).reshape(1, C, B * P)
        yt3 = jnp.transpose(yt3, (1, 0, 2)).reshape(1, C, B * P)
        b_eff, p_eff = 1, B * P
    else:
        b_eff, p_eff = B, P

    TP = _choose_pixel_tile(p_eff, C)
    n_chunks = pl.cdiv(p_eff, TP)
    needs_mask = (p_eff % TP) != 0

    kernel = functools.partial(
        _dist_kernel, T=float(T), C=C, P=p_eff, TP=TP, needs_mask=needs_mask)

    # VMEM budget from the real footprint: 2 inputs x 2 pipeline buffers,
    # 6 accumulator slabs, ~8 elementwise-temporary slabs, plus margin.
    # Capped at 48 MiB so it also fits v7x's 64 MiB/TC physical VMEM.
    c_pad = -(-C // 8) * 8
    slab = c_pad * TP * 4
    vmem_limit = int(min(48 * 1024 * 1024,
                         max(8 * 1024 * 1024, 18 * slab + (2 << 20))))

    parts = pl.pallas_call(
        kernel,
        out_shape=jax.ShapeDtypeStruct((b_eff, C, 8), jnp.float32),
        grid=(b_eff, n_chunks),
        in_specs=[
            pl.BlockSpec((1, C, TP), lambda b, p: (b, 0, p)),
            pl.BlockSpec((1, C, TP), lambda b, p: (b, 0, p)),
        ],
        out_specs=pl.BlockSpec((1, C, 8), lambda b, p: (b, 0, 0)),
        scratch_shapes=[
            pltpu.VMEM((1, TP), jnp.float32),   # running per-lane inter corr
            pltpu.VMEM((C, TP), jnp.float32),   # sum (p_s - 1/C)
            pltpu.VMEM((C, TP), jnp.float32),   # sum (p_t - 1/C)
            pltpu.VMEM((C, TP), jnp.float32),   # sum squares (s)
            pltpu.VMEM((C, TP), jnp.float32),   # sum squares (t)
            pltpu.VMEM((C, TP), jnp.float32),   # sum cross products
        ],
        compiler_params=pltpu.CompilerParams(
            # Batch axis is independent (per-image partials, per-image reset)
            # -> shardable across v7x's two TensorCores; pixel-chunk axis is
            # the sequential reduction.
            dimension_semantics=("parallel", "arbitrary"),
            vmem_limit_bytes=vmem_limit),
    )(ys3, yt3)

    # ---- tiny JAX combine over per-image partials (b_eff * C * 8 floats) -----
    n_f = jnp.float32(N)
    sx = jnp.sum(parts[:, :, 0], axis=0)
    st = jnp.sum(parts[:, :, 1], axis=0)
    sxx = jnp.sum(parts[:, :, 2], axis=0)
    stt = jnp.sum(parts[:, :, 3], axis=0)
    sxt = jnp.sum(parts[:, :, 4], axis=0)
    inter_sum = jnp.sum(parts[:, 0, 5])

    inter_loss = 1.0 - inter_sum / n_f
    cov = sxt - sx * st / n_f
    var_s = jnp.maximum(sxx - sx * sx / n_f, 0.0)
    var_t = jnp.maximum(stt - st * st / n_f, 0.0)
    den = jnp.sqrt(var_s) * jnp.sqrt(var_t) + _EPS
    intra_loss = 1.0 - jnp.mean(cov / den)

    if beta == 1.0 and gamma == 1.0:   # static skip of the scalar muls
        return inter_loss + intra_loss
    return beta * inter_loss + gamma * intra_loss


def _dist_loss_ref(y_s, y_t, *, beta=1.0, gamma=1.0, T=1.0):
    """Pure-JAX reference (mirrors the PyTorch module)."""
    eps = 1e-8
    B, C, h, w = y_s.shape
    ys = jnp.transpose(y_s, (0, 2, 3, 1)).reshape(-1, C).astype(jnp.float32) / T
    yt = jnp.transpose(y_t, (0, 2, 3, 1)).reshape(-1, C).astype(jnp.float32) / T
    p_s = jax.nn.softmax(ys, axis=1)
    p_t = jax.nn.softmax(yt, axis=1)

    def pearson(x, y):
        x = x - x.mean(axis=-1, keepdims=True)
        y = y - y.mean(axis=-1, keepdims=True)
        return (x * y).sum(-1) / (jnp.linalg.norm(x, axis=-1) * jnp.linalg.norm(y, axis=-1) + eps)

    inter = 1.0 - pearson(p_s, p_t).mean()
    intra = 1.0 - pearson(p_s.T, p_t.T).mean()
    return beta * inter + gamma * intra


if __name__ == "__main__":
    key = jax.random.PRNGKey(0)
    k1, k2, k3 = jax.random.split(key, 3)

    B, C, h, w = 2, 4, 16, 16
    H, W = 32, 32
    y_s = jax.random.normal(k1, (B, C, h, w), dtype=jnp.float32)
    y_t = jax.random.normal(k2, (B, C, h, w), dtype=jnp.float32)
    target = jax.random.randint(k3, (B, H, W), 0, C)

    loss = dist_loss(y_s, y_t, target, beta=1.0, gamma=1.0, T=1.0)
    loss = jax.block_until_ready(loss)

    ref = jax.block_until_ready(_dist_loss_ref(y_s, y_t))
    assert jnp.isfinite(loss), "kernel produced non-finite loss"
    assert jnp.allclose(loss, ref, rtol=1e-5, atol=1e-5), (loss, ref)

    print("KERNEL_OK")
</pallas_src>

<mosaic_0001>
module attributes {stable_mosaic.version = 11 : i64} {
  func.func @_dist_kernel(%arg0: i32, %arg1: i32, %arg2: memref<1x4x256xf32, #tpu.memory_space<vmem>>, %arg3: memref<1x4x256xf32, #tpu.memory_space<vmem>>, %arg4: memref<1x4x8xf32, #tpu.memory_space<vmem>>, %arg5: memref<1x256xf32, #tpu.memory_space<vmem>>, %arg6: memref<4x256xf32, #tpu.memory_space<vmem>>, %arg7: memref<4x256xf32, #tpu.memory_space<vmem>>, %arg8: memref<4x256xf32, #tpu.memory_space<vmem>>, %arg9: memref<4x256xf32, #tpu.memory_space<vmem>>, %arg10: memref<4x256xf32, #tpu.memory_space<vmem>>) attributes {dimension_semantics = [#tpu.dimension_semantics<parallel>, #tpu.dimension_semantics<arbitrary>], iteration_bounds = array<i64: 2, 1>, scalar_prefetch = 0 : i64, scratch_operands = 6 : i64, tpu.core_type = #tpu.core_type<tc>, window_params = [{transform_indices = @transform_0, window_bounds = array<i64: 1, 4, 256>}, {transform_indices = @transform_1, window_bounds = array<i64: 1, 4, 256>}, {transform_indices = @transform_2, window_bounds = array<i64: 1, 4, 8>}]} {
    %c0_i32 = arith.constant 0 : i32
    %0 = arith.cmpi eq, %arg1, %c0_i32 : i32
    %1 = arith.extui %0 : i1 to i32
    %c0_i32_0 = arith.constant 0 : i32
    %2 = arith.cmpi ne, %1, %c0_i32_0 : i32
    scf.if %2 {
      %cst_44 = arith.constant 0.000000e+00 : f32
      %64 = vector.broadcast %cst_44 : f32 to vector<1x256xf32>
      %c0_45 = arith.constant 0 : index
      %c0_46 = arith.constant 0 : index
      %65 = vector.load %arg5[%c0_45, %c0_46] : memref<1x256xf32, #tpu.memory_space<vmem>>, vector<1x256xf32>
      tpu.vector_store %arg5[%c0_45, %c0_46], %64 {strides = array<i32>} : memref<1x256xf32, #tpu.memory_space<vmem>>, vector<1x256xf32>,
      %cst_47 = arith.constant 0.000000e+00 : f32
      %66 = vector.broadcast %cst_47 : f32 to vector<4x256xf32>
      %c0_48 = arith.constant 0 : index
      %c0_49 = arith.constant 0 : index
      %67 = vector.load %arg6[%c0_48, %c0_49] : memref<4x256xf32, #tpu.memory_space<vmem>>, vector<4x256xf32>
      tpu.vector_store %arg6[%c0_48, %c0_49], %66 {strides = array<i32>} : memref<4x256xf32, #tpu.memory_space<vmem>>, vector<4x256xf32>,
      %cst_50 = arith.constant 0.000000e+00 : f32
      %68 = vector.broadcast %cst_50 : f32 to vector<4x256xf32>
      %c0_51 = arith.constant 0 : index
      %c0_52 = arith.constant 0 : index
      %69 = vector.load %arg7[%c0_51, %c0_52] : memref<4x256xf32, #tpu.memory_space<vmem>>, vector<4x256xf32>
      tpu.vector_store %arg7[%c0_51, %c0_52], %68 {strides = array<i32>} : memref<4x256xf32, #tpu.memory_space<vmem>>, vector<4x256xf32>,
      %cst_53 = arith.constant 0.000000e+00 : f32
      %70 = vector.broadcast %cst_53 : f32 to vector<4x256xf32>
      %c0_54 = arith.constant 0 : index
      %c0_55 = arith.constant 0 : index
      %71 = vector.load %arg8[%c0_54, %c0_55] : memref<4x256xf32, #tpu.memory_space<vmem>>, vector<4x256xf32>
      tpu.vector_store %arg8[%c0_54, %c0_55], %70 {strides = array<i32>} : memref<4x256xf32, #tpu.memory_space<vmem>>, vector<4x256xf32>,
      %cst_56 = arith.constant 0.000000e+00 : f32
      %72 = vector.broadcast %cst_56 : f32 to vector<4x256xf32>
      %c0_57 = arith.constant 0 : index
      %c0_58 = arith.constant 0 : index
      %73 = vector.load %arg9[%c0_57, %c0_58] : memref<4x256xf32, #tpu.memory_space<vmem>>, vector<4x256xf32>
      tpu.vector_store %arg9[%c0_57, %c0_58], %72 {strides = array<i32>} : memref<4x256xf32, #tpu.memory_space<vmem>>, vector<4x256xf32>,
      %cst_59 = arith.constant 0.000000e+00 : f32
      %74 = vector.broadcast %cst_59 : f32 to vector<4x256xf32>
      %c0_60 = arith.constant 0 : index
      %c0_61 = arith.constant 0 : index
      %75 = vector.load %arg10[%c0_60, %c0_61] : memref<4x256xf32, #tpu.memory_space<vmem>>, vector<4x256xf32>
      tpu.vector_store %arg10[%c0_60, %c0_61], %74 {strides = array<i32>} : memref<4x256xf32, #tpu.memory_space<vmem>>, vector<4x256xf32>,
    } else {
    }
    %c0 = arith.constant 0 : index
    %c0_1 = arith.constant 0 : index
    %c0_2 = arith.constant 0 : index
    %3 = vector.load %arg2[%c0, %c0_1, %c0_2] : memref<1x4x256xf32, #tpu.memory_space<vmem>>, vector<1x4x256xf32>
    %4 = vector.shape_cast %3 : vector<1x4x256xf32> to vector<4x256xf32>
    %c0_3 = arith.constant 0 : index
    %c0_4 = arith.constant 0 : index
    %c0_5 = arith.constant 0 : index
    %5 = vector.load %arg3[%c0_3, %c0_4, %c0_5] : memref<1x4x256xf32, #tpu.memory_space<vmem>>, vector<1x4x256xf32>
    %6 = vector.shape_cast %5 : vector<1x4x256xf32> to vector<4x256xf32>
    %cst = arith.constant dense<0xFF800000> : vector<256xf32>
    %7 = vector.multi_reduction <maximumf>, %4, %cst [0] : vector<4x256xf32> to vector<256xf32>
    %8 = vector.shape_cast %7 : vector<256xf32> to vector<1x256xf32>
    %9 = vector.broadcast %8 : vector<1x256xf32> to vector<4x256xf32>
    %10 = arith.subf %4, %9 : vector<4x256xf32>
    %cst_6 = arith.constant dense<0xFF800000> : vector<256xf32>
    %11 = vector.multi_reduction <maximumf>, %6, %cst_6 [0] : vector<4x256xf32> to vector<256xf32>
    %12 = vector.shape_cast %11 : vector<256xf32> to vector<1x256xf32>
    %13 = vector.broadcast %12 : vector<1x256xf32> to vector<4x256xf32>
    %14 = arith.subf %6, %13 : vector<4x256xf32>
    %15 = math.exp %10 : vector<4x256xf32>
    %16 = math.exp %14 : vector<4x256xf32>
    %cst_7 = arith.constant 1.000000e+00 : f32
    %17 = vector.broadcast %cst_7 : f32 to vector<1x4xf32>
    %cst_8 = arith.constant dense<0.000000e+00> : vector<1x256xf32>
    %18 = tpu.matmul %17, %15, %cst_8 {dimension_numbers = #tpu.dot_dimension_numbers<[1], [0], [0], [1], [0, 0, 1, 1], [], []>, precision = #tpu.contract_precision<fp32>} : vector<1x4xf32>, vector<4x256xf32>, vector<1x256xf32> -> vector<1x256xf32>
    %cst_9 = arith.constant 1.000000e+00 : f32
    %19 = vector.broadcast %cst_9 : f32 to vector<1x256xf32>
    %20 = arith.divf %19, %18 : vector<1x256xf32>
    %21 = vector.broadcast %20 : vector<1x256xf32> to vector<4x256xf32>
    %22 = arith.mulf %15, %21 : vector<4x256xf32>
    %cst_10 = arith.constant dense<0.000000e+00> : vector<1x256xf32>
    %23 = tpu.matmul %17, %16, %cst_10 {dimension_numbers = #tpu.dot_dimension_numbers<[1], [0], [0], [1], [0, 0, 1, 1], [], []>, precision = #tpu.contract_precision<fp32>} : vector<1x4xf32>, vector<4x256xf32>, vector<1x256xf32> -> vector<1x256xf32>
    %cst_11 = arith.constant 1.000000e+00 : f32
    %24 = vector.broadcast %cst_11 : f32 to vector<1x256xf32>
    %25 = arith.divf %24, %23 : vector<1x256xf32>
    %26 = vector.broadcast %25 : vector<1x256xf32> to vector<4x256xf32>
    %27 = arith.mulf %16, %26 : vector<4x256xf32>
    %cst_12 = arith.constant 2.500000e-01 : f32
    %28 = vector.broadcast %cst_12 : f32 to vector<4x256xf32>
    %29 = arith.subf %22, %28 : vector<4x256xf32>
    %cst_13 = arith.constant 2.500000e-01 : f32
    %30 = vector.broadcast %cst_13 : f32 to vector<4x256xf32>
    %31 = arith.subf %27, %30 : vector<4x256xf32>
    %32 = arith.mulf %29, %29 : vector<4x256xf32>
    %33 = arith.mulf %31, %31 : vector<4x256xf32>
    %34 = arith.mulf %29, %31 : vector<4x256xf32>
    %cst_14 = arith.constant dense<0.000000e+00> : vector<1x256xf32>
    %35 = tpu.matmul %17, %34, %cst_14 {dimension_numbers = #tpu.dot_dimension_numbers<[1], [0], [0], [1], [0, 0, 1, 1], [], []>, precision = #tpu.contract_precision<fp32>} : vector<1x4xf32>, vector<4x256xf32>, vector<1x256xf32> -> vector<1x256xf32>
    %cst_15 = arith.constant dense<0.000000e+00> : vector<1x256xf32>
    %36 = tpu.matmul %17, %32, %cst_15 {dimension_numbers = #tpu.dot_dimension_numbers<[1], [0], [0], [1], [0, 0, 1, 1], [], []>, precision = #tpu.contract_precision<fp32>} : vector<1x4xf32>, vector<4x256xf32>, vector<1x256xf32> -> vector<1x256xf32>
    %cst_16 = arith.constant dense<0.000000e+00> : vector<1x256xf32>
    %37 = tpu.matmul %17, %33, %cst_16 {dimension_numbers = #tpu.dot_dimension_numbers<[1], [0], [0], [1], [0, 0, 1, 1], [], []>, precision = #tpu.contract_precision<fp32>} : vector<1x4xf32>, vector<4x256xf32>, vector<1x256xf32> -> vector<1x256xf32>
    %38 = arith.mulf %36, %37 : vector<1x256xf32>
    %cst_17 = arith.constant 1.000000e-16 : f32
    %39 = vector.broadcast %cst_17 : f32 to vector<1x256xf32>
    %40 = arith.addf %38, %39 : vector<1x256xf32>
    %41 = math.rsqrt %40 : vector<1x256xf32>
    %42 = arith.mulf %35, %41 : vector<1x256xf32>
    %c0_18 = arith.constant 0 : index
    %c0_19 = arith.constant 0 : index
    %43 = vector.load %arg5[%c0_18, %c0_19] : memref<1x256xf32, #tpu.memory_space<vmem>>, vector<1x256xf32>
    %44 = arith.addf %43, %42 : vector<1x256xf32>
    %c0_20 = arith.constant 0 : index
    %c0_21 = arith.constant 0 : index
    %45 = vector.load %arg5[%c0_20, %c0_21] : memref<1x256xf32, #tpu.memory_space<vmem>>, vector<1x256xf32>
    tpu.vector_store %arg5[%c0_20, %c0_21], %44 {strides = array<i32>} : memref<1x256xf32, #tpu.memory_space<vmem>>, vector<1x256xf32>,
    %c0_22 = arith.constant 0 : index
    %c0_23 = arith.constant 0 : index
    %46 = vector.load %arg6[%c0_22, %c0_23] : memref<4x256xf32, #tpu.memory_space<vmem>>, vector<4x256xf32>
    %47 = arith.addf %46, %29 : vector<4x256xf32>
    %c0_24 = arith.constant 0 : index
    %c0_25 = arith.constant 0 : index
    %48 = vector.load %arg6[%c0_24, %c0_25] : memref<4x256xf32, #tpu.memory_space<vmem>>, vector<4x256xf32>
    tpu.vector_store %arg6[%c0_24, %c0_25], %47 {strides = array<i32>} : memref<4x256xf32, #tpu.memory_space<vmem>>, vector<4x256xf32>,
    %c0_26 = arith.constant 0 : index
    %c0_27 = arith.constant 0 : index
    %49 = vector.load %arg7[%c0_26, %c0_27] : memref<4x256xf32, #tpu.memory_space<vmem>>, vector<4x256xf32>
    %50 = arith.addf %49, %31 : vector<4x256xf32>
    %c0_28 = arith.constant 0 : index
    %c0_29 = arith.constant 0 : index
    %51 = vector.load %arg7[%c0_28, %c0_29] : memref<4x256xf32, #tpu.memory_space<vmem>>, vector<4x256xf32>
    tpu.vector_store %arg7[%c0_28, %c0_29], %50 {strides = array<i32>} : memref<4x256xf32, #tpu.memory_space<vmem>>, vector<4x256xf32>,
    %c0_30 = arith.constant 0 : index
    %c0_31 = arith.constant 0 : index
    %52 = vector.load %arg8[%c0_30, %c0_31] : memref<4x256xf32, #tpu.memory_space<vmem>>, vector<4x256xf32>
    %53 = arith.addf %52, %32 : vector<4x256xf32>
    %c0_32 = arith.constant 0 : index
    %c0_33 = arith.constant 0 : index
    %54 = vector.load %arg8[%c0_32, %c0_33] : memref<4x256xf32, #tpu.memory_space<vmem>>, vector<4x256xf32>
    tpu.vector_store %arg8[%c0_32, %c0_33], %53 {strides = array<i32>} : memref<4x256xf32, #tpu.memory_space<vmem>>, vector<4x256xf32>,
    %c0_34 = arith.constant 0 : index
    %c0_35 = arith.constant 0 : index
    %55 = vector.load %arg9[%c0_34, %c0_35] : memref<4x256xf32, #tpu.memory_space<vmem>>, vector<4x256xf32>
    %56 = arith.addf %55, %33 : vector<4x256xf32>
    %c0_36 = arith.constant 0 : index
    %c0_37 = arith.constant 0 : index
    %57 = vector.load %arg9[%c0_36, %c0_37] : memref<4x256xf32, #tpu.memory_space<vmem>>, vector<4x256xf32>
    tpu.vector_store %arg9[%c0_36, %c0_37], %56 {strides = array<i32>} : memref<4x256xf32, #tpu.memory_space<vmem>>, vector<4x256xf32>,
    %c0_38 = arith.constant 0 : index
    %c0_39 = arith.constant 0 : index
    %58 = vector.load %arg10[%c0_38, %c0_39] : memref<4x256xf32, #tpu.memory_space<vmem>>, vector<4x256xf32>
    %59 = arith.addf %58, %34 : vector<4x256xf32>
    %c0_40 = arith.constant 0 : index
    %c0_41 = arith.constant 0 : index
    %60 = vector.load %arg10[%c0_40, %c0_41] : memref<4x256xf32, #tpu.memory_space<vmem>>, vector<4x256xf32>
    tpu.vector_store %arg10[%c0_40, %c0_41], %59 {strides = array<i32>} : memref<4x256xf32, #tpu.memory_space<vmem>>, vector<4x256xf32>,
    %c0_i32_42 = arith.constant 0 : i32
    %61 = arith.cmpi eq, %arg1, %c0_i32_42 : i32
    %62 = arith.extui %61 : i1 to i32
    %c0_i32_43 = arith.constant 0 : i32
    %63 = arith.cmpi ne, %62, %c0_i32_43 : i32
    scf.if %63 {
      %c0_44 = arith.constant 0 : index
      %c0_45 = arith.constant 0 : index
      %64 = vector.load %arg6[%c0_44, %c0_45] : memref<4x256xf32, #tpu.memory_space<vmem>>, vector<4x256xf32>
      %cst_46 = arith.constant dense<0.000000e+00> : vector<4xf32>
      %65 = vector.multi_reduction <add>, %64, %cst_46 [1] : vector<4x256xf32> to vector<4xf32>
      %66 = vector.shape_cast %65 : vector<4xf32> to vector<4x1xf32>
      %c0_47 = arith.constant 0 : index
      %c0_48 = arith.constant 0 : index
      %67 = vector.load %arg7[%c0_47, %c0_48] : memref<4x256xf32, #tpu.memory_space<vmem>>, vector<4x256xf32>
      %cst_49 = arith.constant dense<0.000000e+00> : vector<4xf32>
      %68 = vector.multi_reduction <add>, %67, %cst_49 [1] : vector<4x256xf32> to vector<4xf32>
      %69 = vector.shape_cast %68 : vector<4xf32> to vector<4x1xf32>
      %c0_50 = arith.constant 0 : index
      %c0_51 = arith.constant 0 : index
      %70 = vector.load %arg8[%c0_50, %c0_51] : memref<4x256xf32, #tpu.memory_space<vmem>>, vector<4x256xf32>
      %cst_52 = arith.constant dense<0.000000e+00> : vector<4xf32>
      %71 = vector.multi_reduction <add>, %70, %cst_52 [1] : vector<4x256xf32> to vector<4xf32>
      %72 = vector.shape_cast %71 : vector<4xf32> to vector<4x1xf32>
      %c0_53 = arith.constant 0 : index
      %c0_54 = arith.constant 0 : index
      %73 = vector.load %arg9[%c0_53, %c0_54] : memref<4x256xf32, #tpu.memory_space<vmem>>, vector<4x256xf32>
      %cst_55 = arith.constant dense<0.000000e+00> : vector<4xf32>
      %74 = vector.multi_reduction <add>, %73, %cst_55 [1] : vector<4x256xf32> to vector<4xf32>
      %75 = vector.shape_cast %74 : vector<4xf32> to vector<4x1xf32>
      %c0_56 = arith.constant 0 : index
      %c0_57 = arith.constant 0 : index
      %76 = vector.load %arg10[%c0_56, %c0_57] : memref<4x256xf32, #tpu.memory_space<vmem>>, vector<4x256xf32>
      %cst_58 = arith.constant dense<0.000000e+00> : vector<4xf32>
      %77 = vector.multi_reduction <add>, %76, %cst_58 [1] : vector<4x256xf32> to vector<4xf32>
      %78 = vector.shape_cast %77 : vector<4xf32> to vector<4x1xf32>
      %c0_59 = arith.constant 0 : index
      %c0_60 = arith.constant 0 : index
      %79 = vector.load %arg5[%c0_59, %c0_60] : memref<1x256xf32, #tpu.memory_space<vmem>>, vector<1x256xf32>
      %cst_61 = arith.constant dense<0.000000e+00> : vector<1xf32>
      %80 = vector.multi_reduction <add>, %79, %cst_61 [1] : vector<1x256xf32> to vector<1xf32>
      %81 = vector.shape_cast %80 : vector<1xf32> to vector<1x1xf32>
      %82 = vector.shape_cast %81 : vector<1x1xf32> to vector<1x1xf32>
      %83 = vector.broadcast %82 : vector<1x1xf32> to vector<4x1xf32>
      %cst_62 = arith.constant 0.000000e+00 : f32
      %84 = vector.broadcast %cst_62 : f32 to vector<4x2xf32>
      %85 = tpu.concatenate %66, %69, %72, %75, %78, %83, %84 in 1 : vector<4x1xf32>, vector<4x1xf32>, vector<4x1xf32>, vector<4x1xf32>, vector<4x1xf32>, vector<4x1xf32>, vector<4x2xf32> -> vector<4x8xf32>
      %c0_63 = arith.constant 0 : index
      %c0_64 = arith.constant 0 : index
      %c0_65 = arith.constant 0 : index
      %86 = vector.load %arg4[%c0_63, %c0_64, %c0_65] : memref<1x4x8xf32, #tpu.memory_space<vmem>>, vector<1x4x8xf32>
      %87 = vector.shape_cast %86 : vector<1x4x8xf32> to vector<4x8xf32>
      %88 = vector.shape_cast %85 : vector<4x8xf32> to vector<1x4x8xf32>
      tpu.vector_store %arg4[%c0_63, %c0_64, %c0_65], %88 {strides = array<i32>} : memref<1x4x8xf32, #tpu.memory_space<vmem>>, vector<1x4x8xf32>,
    } else {
    }
    return
  }
  func.func @transform_0(%arg0: i32, %arg1: i32) -> (i32, i32, i32) {
    %c0_i32 = arith.constant 0 : i32
    %c0_i32_0 = arith.constant 0 : i32
    return %arg0, %c0_i32, %arg1 : i32, i32, i32
  }
  func.func @transform_1(%arg0: i32, %arg1: i32) -> (i32, i32, i32) {
    %c0_i32 = arith.constant 0 : i32
    %c0_i32_0 = arith.constant 0 : i32
    return %arg0, %c0_i32, %arg1 : i32, i32, i32
  }
  func.func @transform_2(%arg0: i32, %arg1: i32) -> (i32, i32, i32) {
    %c0_i32 = arith.constant 0 : i32
    %c0_i32_0 = arith.constant 0 : i32
    %c0_i32_1 = arith.constant 0 : i32
    return %arg0, %c0_i32, %c0_i32_0 : i32, i32, i32
  }
}

</mosaic_0001>

<bundles_post_ra>
// kernel: tpu_custom_call.1
= control target key start
LH: loop header
LB: loop body
LE: loop exit
PB: predicated region body
PF: predicated region fallthrough
CT: control target
= control target key end

     0   :  { %7 = vsyncpa [#allocation9], 0  ;;  %s3648_s0 = inlined_call_operand.hbm [shape: f32[2,4,256], index: 0, kind: input, shape index: {}]   ;;  %s3649_s1 = inlined_call_operand.hbm [shape: f32[2,4,256], index: 1, kind: input, shape index: {}]   ;;  %s3650_s2 = inlined_call_operand.hbm [shape: f32[2,4,8], index: 2, kind: output, shape index: {}]  }
   0x1   :  { %9 = vsyncpa [#allocation9 + $0x1], 0 }
   0x2   :  { %10 = vsyncpa [#allocation12], 0 }
   0x3   :  { %12 = vsyncpa [#allocation12 + $0x1], 0 }
   0x4   :  { %13 = vsyncpa [#allocation10], 0 }
   0x5   :  { %15 = vsyncpa [#allocation10 + $0x1], 0  ;;  %s3281_s9 = smov 0   ;;  %s3283_s10 = smov 0  }
   0x6   :  { %s3285_s11 = smov 0   ;;  %s3287_s12 = smov 0  }
   0x7   :  { %s3289_s13 = smov 0   ;;  %s3291_s14 = smov 0  }
   0x8 LB: > { %s2935_s15 = sadd.s32 4294967295, %s3257_s14   ;;  %s2936_s16 = sadd.s32 4294967294, %s3257_s14   ;;  %s3257_s14 = sphi %s3291_s14, %s21_s14   ;;  %s3253_s13 = sphi %s3289_s13, %s3672_s13   ;;  %s3249_s12 = sphi %s3287_s12, %s3671_s12   ;;  %s3245_s11 = sphi %s3285_s11, %s3670_s11   ;;  %s3241_s10 = sphi %s3283_s10, %s3669_s10   ;;  %s3237_s9 = sphi %s3281_s9, %s3668_s9  }
   0x9   : > { %s33_s17 = sadd.s32 1, %s3253_s13  ;;  %s42_s18 = sadd.s32 1, %s3245_s11 }
   0xa   : > { %p35_p0 = scmp.ge.s32.totalorder %s33_s17, 2  ;;  %p49_p1 = scmp.ne.s32.totalorder %s3245_s11, %s3241_s10 }
   0xb   : > { %p50_p2 = scmp.eq.s32.totalorder %s3257_s14, 0  ;;  %p55_p3 = scmp.ne.s32.totalorder %s3241_s10, %s3237_s9 }
   0xc   : > { %s3674_s17 = smov (%p35_p0, %s33_s17), 0  ;;  %p56_p5 = scmp.eq.s32.totalorder %s2935_s15, 0 }
   0xd   : > { %p3322_p4 = por %p50_p2, %p49_p1  ;;  %s37_s20 = ssub.s32 %s3253_s13, %s3674_s17 }
   0xe   : > { %p107_p6 = scmp.eq.s32.totalorder %s2935_s15, 1  ;;  %p40_p7 = scmp.eq.s32.totalorder %s37_s20, 0 }
   0xf   : > { %p3328_p8 = por %p56_p5, %p55_p3  ;;  %p113_p10 = scmp.eq.s32.totalorder %s2936_s16, 1 }
  0x10   : > { %p3332_p9 = por %p107_p6, %p49_p1  ;;  %p3039_p13 = scmp.lt.s32.totalorder %s3257_s14, 2 }
  0x11   : > { %s3654_s21 = scalar_select %p3328_p8, 1, 0 }
  0x12   : > { %s3655_s22 = scalar_select %p3332_p9, 1, 0 }
  0x13   : > { %s3337_s23 = scalar_select %p40_p7, %s3245_s11, %s42_s18  }
  0x14   : > { %p3339_p11 = por %p113_p10, %p55_p3  ;;  %s3346_s25 = sand.u32 1, %s3245_s11  }
  0x15   : > { %s2939_s26 = sshll.u32 %s3346_s25, 3  ;;  %s2970_s27 = sshll.u32 %s3253_s13, 7 }
  0x16   : > { %s3656_s24 = scalar_select %p3339_p11, 1, 0 }
  0x17   : > { %s3355_s30 = scalar_lea.hbm %s3648_s0, %s2970_s27  ;;  %s137_s3 = scalar_lea.vmem [#allocation8], %s2939_s26 }
  0x18   : > { %s147_s4 = sshll.u32 %s137_s3, 4  ;;  %p3363_p0 = pnand %p3039_p13, %p3322_p4  ;;  %s3359_s4 = int_to_ptr.vmem [resolvable:$true] %s147_s4 }
  0x19   : > { %s134_s6 = scalar_lea.sflag [#allocation9], %s3346_s25  ;;  %s3111_s7 = scalar_lea.hbm %s3355_s30, 128 }
  0x1a   : > { %p3112_p3 = scmp.ne.s32.totalorder %s3355_s30, %s3111_s7  ;;  %p3113_p5 = pneg %p3363_p0 }
  0x1b   : > { %s3116_s16 = scalar_lea.hbm %s3648_s0, 256  ;;  %p3117_p4 = scmp.lt.u32.totalorder %s3355_s30, %s3648_s0 }
  0x1c   : > { %p3114_p6 = pnand %p3113_p5, %p3112_p3  ;;  %p3118_p10 = scmp.lt.u32.totalorder %s3116_s16, %s3111_s7 }
  0x1d   : > { %p3120_p12 = scmp.lt.u32.totalorder %s3111_s7, %s3355_s30 }
  0x1e   : > { %p3115_p7 = pneg %p3114_p6  ;;  %p3119_p13 = por %p3118_p10, %p3117_p4 }
  0x20   : > { %p3121_p1 = por %p3120_p12, %p3119_p13 }
  0x22   : > { %p3122_p2 = pnand %p3121_p1, %p3115_p7 }
  0x24   : > { %3125 = shalt.err (!%p3122_p2)
}
  0x25   : > { %s3126_s20 = scalar_lea.vmem %s3359_s4, 128  ;;  %s3259_s28 = smov [#allocation8]  }
  0x26   : > { %p3127_p3 = scmp.ne.s32.totalorder %s3359_s4, %s3126_s20  ;;  %s3131_s29 = sshll.u32 %s3259_s28, 4  ;;  %s3132_s29 = int_to_ptr.vmem [resolvable:$false] %s3131_s29 }
  0x27   : > { %s3133_s3 = scalar_lea.vmem %s3132_s29, 256  ;;  %p3134_p9 = scmp.lt.s32.totalorder %s3359_s4, %s3132_s29 }
  0x28   : > { %p3129_p6 = pnand %p3127_p3, %p3113_p5  ;;  %p3135_p4 = scmp.lt.s32.totalorder %s3133_s3, %s3126_s20 }
  0x2a   : > { %p3130_p11 = pneg %p3129_p6  ;;  %p3136_p10 = por %p3135_p4, %p3134_p9 }
  0x2c   : > { %p3137_p12 = pnand %p3136_p10, %p3130_p11 }
  0x2e   : > { %3140 = shalt.err (!%p3137_p12)
}
  0x2f   : > { %3031 = dma.hbm_to_vmem [thread:$0]  (!%p3363_p0), %s3355_s30, 128, %s3359_s4, %s134_s6  }
  0x30   : > { %p3658_p1 = scmp.lt.s32.totalorder %s3257_s14, 3  ;;  %p3659_p2 = scmp.ge.s32.totalorder %s3257_s14, 1 }
  0x31   : > { %s3408_s16 = scalar_lea.hbm %s3649_s1, %s2970_s27  ;;  %s158_s18 = scalar_lea.vmem [#allocation11], %s2939_s26 }
  0x32   : > { %p3399_p7 = pnand %p3659_p2, %p3658_p1  ;;  %s168_s19 = sshll.u32 %s158_s18, 4  ;;  %s169_s19 = int_to_ptr.vmem [resolvable:$true] %s168_s19 }
  0x33   : > { %s155_s30 = scalar_lea.sflag [#allocation12], %s3346_s25  ;;  %s3141_s4 = scalar_lea.hbm %s3408_s16, 128 }
  0x34   : > { %s3660_s7 = scalar_select %p3399_p7, 1, 0 }
  0x35   : > { %p3142_p9 = scmp.ne.s32.totalorder %s3408_s16, %s3141_s4  ;;  %s3146_s27 = scalar_lea.hbm %s3649_s1, 256 }
  0x36   : > { %p3147_p3 = scmp.lt.u32.totalorder %s3408_s16, %s3649_s1  ;;  %p3148_p6 = scmp.lt.u32.totalorder %s3146_s27, %s3141_s4 }
  0x37   : > { %p3144_p11 = pnand %p3142_p9, %p3113_p5  ;;  %p3150_p10 = scmp.lt.u32.totalorder %s3141_s4, %s3408_s16 }
  0x38   : > { %p3149_p4 = por %p3148_p6, %p3147_p3 }
  0x39   : > { %p3145_p13 = pneg %p3144_p11 }
  0x3a   : > { %p3151_p12 = por %p3150_p10, %p3149_p4 }
  0x3c   : > { %p3152_p1 = pnand %p3151_p12, %p3145_p13 }
  0x3e   : > { %3155 = shalt.err (!%p3152_p1)
}
  0x3f   : > { %s3156_s25 = scalar_lea.vmem %s169_s19, 128  ;;  %s3260_s26 = smov [#allocation11]  }
  0x40   : > { %p3157_p2 = scmp.ne.s32.totalorder %s169_s19, %s3156_s25  ;;  %s3161_s3 = sshll.u32 %s3260_s26, 4  ;;  %s3162_s3 = int_to_ptr.vmem [resolvable:$false] %s3161_s3 }
  0x41   : > { %s3163_s8 = scalar_lea.vmem %s3162_s3, 256  ;;  %p3164_p8 = scmp.lt.s32.totalorder %s169_s19, %s3162_s3 }
  0x42   : > { %p3159_p9 = pnand %p3157_p2, %p3113_p5  ;;  %p3165_p7 = scmp.lt.s32.totalorder %s3163_s8, %s3156_s25 }
  0x44   : > { %p3160_p11 = pneg %p3159_p9  ;;  %p3166_p3 = por %p3165_p7, %p3164_p8 }
  0x46   : > { %p3167_p6 = pnand %p3166_p3, %p3160_p11 }
  0x48   : > { %3170 = shalt.err (!%p3167_p6)
}
  0x49   : > { %3034 = dma.hbm_to_vmem [thread:$0]  (!%p3363_p0), %s3408_s16, 128, %s169_s19, %s155_s30  }
  0x4a   : > { %p3661_p13 = scmp.ne.s32.totalorder %s3660_s7, 0 }
  0x4b   : > { %s3435_s15 = sand.u32 (!%p3661_p13), 1, %s3241_s10   ;;  %p3662_p5 = scmp.ne.s32.totalorder (!%p3661_p13), %s3654_s21, 0 }
  0x4c   : > { %177 = sbr.rel (%p3661_p13) target bundleno = 922 (0x39a), region = 28  ;;  %s2946_s18 = sshll.u32 (!%p3661_p13), %s3435_s15, 3 }
  0x4d   : > { %s180_s4 = scalar_lea.sflag (!%p3661_p13), [#allocation9], %s3435_s15  ;;  %s183_s6 = scalar_lea.vmem (!%p3661_p13), [#allocation8], %s2946_s18 }
  0x53   : > { %3224 = dma.done.wait (%p3662_p5), %s180_s4, 128  }
  0x54   : > { %3226 = vsyncadd (%p3662_p5), %s180_s4, 4294967168  ;;  %s189_s5 = scalar_lea.sflag [#allocation12], %s3435_s15  ;;  %s192_s16 = scalar_lea.vmem [#allocation11], %s2946_s18 }
  0x55   : > { %3228 = dma.done.wait (%p3662_p5), %s189_s5, 128  }
  0x56   : > { %3230 = vsyncadd (%p3662_p5), %s189_s5, 4294967168  ;;  %v224_v0 = vlaneseq  ;;  %v3261_v1 = vmov 0.0   ;;  %vm239_vm1 = vcmask 1043456   ;;  %v234_v3 = vld [vmem:[%s183_s6] sm:$0xff]  ;;  %v235_v4 = vld [vmem:[%s192_s16] sm:$0xff]  ;;  %vm287_vm2 = vcmask 31744  }
  0x57   : > { %361 = vmatprep.mubr.f32.mxu1 %v3261_v1  ;;  %598 = vmatprep.mubr.f32.mxu0 %v3261_v1  ;;  %v237_v5 = vcombine.high %v234_v3, %v234_v3  ;;  %v240_v6 = vsel %vm239_vm1, %v234_v3, -inf  ;;  %v260_v7 = vcombine.high %v235_v4, %v235_v4  ;;  %v262_v8 = vsel %vm239_vm1, %v235_v4, -inf  ;;  %s2948_s21 = sshll.u32 %s3435_s15, 2  ;;  %s2967_s7 = sshll.u32 %s3249_s12, 6 }
  0x58   : > { %vm3451_vm0 = vcmp.lt.s32.totalorder %v224_v0, 256  ;;  %v241_v9 = vrot.slane %v240_v6, 4  ;;  %v263_v10 = vrot.slane %v262_v8, 4  ;;  %v3262_v41 = vmov 0   ;;  %s217_s19 = scalar_lea.vmem [#allocation13], %s2948_s21  ;;  %s3599_s28 = scalar_lea.hbm %s3650_s2, %s2967_s7 }
  0x59   : > { %228 = vst.msk [vmem:[#allocation2] sm:$0x3] %vm3451_vm0, %v3261_v1  ;;  %v247_v11 = vsel %vm239_vm1, %v237_v5, -inf  ;;  %v269_v12 = vsel %vm239_vm1, %v260_v7, -inf  ;;  %v289_v42 = vsel %vm287_vm2, 1.0, %v3262_v41  ;;  %vm2791_vm3 = vcmask 1040384  }
  0x5a   : > { %v242_v13 = vmax.f32 %v240_v6, %v241_v9  ;;  %v248_v14 = vrot.slane %v247_v11, 4  ;;  %v264_v15 = vmax.f32 %v262_v8, %v263_v10  ;;  %v270_v16 = vrot.slane %v269_v12, 4  ;;  %s2828_s30 = sshll.u32 %s217_s19, 4  ;;  %s2815_s12 = scalar_lea.sflag [#allocation10], %s3435_s15  ;;  %s3601_s30 = int_to_ptr.vmem [resolvable:$true] %s2828_s30 }
  0x5b   : > { %v3463_v43 = vsub.f32 %v289_v42, %v289_v42  ;;  %v3263_v9 = vmov 1.0   ;;  %vm2801_vm4 = vcmask 7168   ;;  %vm2803_vm5 = vcmask 15360   ;;  %s3171_s29 = scalar_lea.vmem %s3601_s30, 64  ;;  %p3665_p0 = scmp.ne.s32.totalorder %s3655_s22, 0 }
  0x5c   : > { %v243_v17 = vrot.slane %v242_v13, 2  ;;  %v249_v18 = vmax.f32 %v247_v11, %v248_v14  ;;  %v265_v19 = vrot.slane %v264_v15, 2  ;;  %v271_v20 = vmax.f32 %v269_v12, %v270_v16  ;;  %p3172_p8 = scmp.ne.s32.totalorder %s3601_s30, %s3171_s29  ;;  %s3265_s25 = smov [#allocation13]  }
  0x5d   : > { %v3466_v44 = vand.u32 4294901760, %v3463_v43  ;;  %vm2805_vm6 = vcmask 23552   ;;  %vm2808_vm7 = vcmask 39936   ;;  %vm2810_vm8 = vcmask 48128   ;;  %s3175_s26 = sshll.u32 %s3265_s25, 4  ;;  %s3176_s26 = int_to_ptr.vmem [resolvable:$false] %s3175_s26 }
  0x5e   : > { %v244_v21 = vmax.f32 %v242_v13, %v243_v17  ;;  %v250_v22 = vrot.slane %v249_v18, 2  ;;  %v266_v23 = vmax.f32 %v264_v15, %v265_v19  ;;  %v272_v24 = vrot.slane %v271_v20, 2  ;;  %p3173_p7 = pnand %p3172_p8, %p3665_p0  ;;  %s3177_s3 = scalar_lea.vmem %s3176_s26, 128 }
  0x5f   : > { %v365_v46 = vsub.f32 %v3463_v43, %v3466_v44  ;;  %vm2812_vm9 = vcmask 60416   ;;  %p3178_p10 = scmp.lt.s32.totalorder %s3601_s30, %s3176_s26  ;;  %p3179_p12 = scmp.lt.s32.totalorder %s3177_s3, %s3171_s29 }
  0x60   : > { %v245_v25 = vrot.slane %v244_v21, 1  ;;  %v251_v26 = vmax.f32 %v249_v18, %v250_v22  ;;  %v267_v27 = vrot.slane %v266_v23, 1  ;;  %v273_v28 = vmax.f32 %v271_v20, %v272_v24  ;;  %p3174_p4 = pneg %p3173_p7 }
  0x61   : > { %v3481_v55 = vand.u32 4294901760, %v365_v46  ;;  %p3180_p1 = por %p3179_p12, %p3178_p10 }
  0x62   : > { %v246_v29 = vmax.f32 %v244_v21, %v245_v25  ;;  %v252_v30 = vrot.slane %v251_v26, 1  ;;  %v268_v31 = vmax.f32 %v266_v23, %v267_v27  ;;  %v274_v32 = vrot.slane %v273_v28, 1 }
  0x63   : > { %v3517_v21 = vshrl.u32 %v224_v0, 7  ;;  %p3181_p2 = pnand %p3180_p1, %p3174_p4 }
  0x64   : > { %v253_v33 = vmax.f32 %v251_v26, %v252_v30  ;;  %v275_v34 = vmax.f32 %v273_v28, %v274_v32 }
  0x65   : > { %v3520_v22 = vsub.s32 0, %v3517_v21 }
  0x66   : > { %v256_v35 = vcombine.low %v246_v29, %v253_v33  ;;  %v278_v36 = vcombine.low %v268_v31, %v275_v34 }
  0x68   : > { %v258_v37 = vsub.f32 %v234_v3, %v256_v35  ;;  %v280_v38 = vsub.f32 %v235_v4, %v278_v36 }
  0x6a   : > { %v281_v39 = vmul.f32 1.442695, %v258_v37  ;;  %v283_v40 = vmul.f32 1.442695, %v280_v38 }
  0x6c   : > { %3095 = vpow2.f32 %v281_v39 }
  0x6d   : > { %3097 = vpow2.f32 %v283_v40 }
  0x76   : > { %v3468_v45 = vpop.eup %3095 }
  0x77   : > { %v3472_v47 = vpop.eup %3097  ;;  %v286_v48 = vcombine.high %v3468_v45, %v3468_v45  ;;  %v291_v49 = vsel %vm239_vm1, %v3468_v45, 0 }
  0x78   : > { %v297_v50 = vand.u32 4294901760, %v291_v49  ;;  %v778_v51 = vcombine.high %v3472_v47, %v3472_v47  ;;  %v779_v60 = vsel %vm239_vm1, %v3472_v47, 0 }
  0x79   : > { %v293_v52 = vsel %vm239_vm1, %v286_v48, 0  ;;  %v785_v63 = vand.u32 4294901760, %v779_v60 }
  0x7a   : > { %v295_v53 = vand.u32 4294901760, %v293_v52  ;;  %v380_v54 = vsub.f32 %v291_v49, %v297_v50  ;;  %v781_v56 = vsel %vm239_vm1, %v778_v51, 0 }
  0x7b   : > { %v783_v59 = vand.u32 4294901760, %v781_v56  ;;  %v868_v7 = vsub.f32 %v779_v60, %v785_v63 }
  0x7c   : > { %296 = vmatprep.subr.mxu1 %v295_v53  ;;  %533 = vmatprep.subr.mxu0 %v295_v53  ;;  %v374_v57 = vsub.f32 %v293_v52, %v295_v53  ;;  %v381_v58 = vand.u32 4294901760, %v380_v54 }
  0x7d   : > { %298 = vmatpush1.msra.mxu1 %v297_v50  ;;  %535 = vmatpush1.msra.mxu0 %v297_v50  ;;  %v862_v4 = vsub.f32 %v781_v56, %v783_v59  ;;  %v869_v10 = vand.u32 4294901760, %v868_v7 }
  0x7e   : > { %367 = vmatmul.mubr.f32.vlgmr.msra.gmra.mrb[0].mxu1 %v3481_v55  ;;  %602 = vmatmul.mubr.f32.vlgmr.msra.gmra.mrb[0].mxu0 %v3466_v44  ;;  %v375_v61 = vand.u32 4294901760, %v374_v57  ;;  %v382_v62 = vsub.f32 %v380_v54, %v381_v58 }
  0x7f   : > { %447 = vmatprep.mubr.f32.mxu1 %v3261_v1  ;;  %678 = vmatprep.mubr.f32.mxu0 %v3261_v1  ;;  %v863_v8 = vand.u32 4294901760, %v862_v4  ;;  %v870_v12 = vsub.f32 %v868_v7, %v869_v10 }
  0x80   : > { %v376_v3 = vsub.f32 %v374_v57, %v375_v61  ;;  %611 = vmatprep.subr.mxu0 %v375_v61  ;;  %v383_v5 = vand.u32 4294901760, %v382_v62 }
  0x81   : > { %615 = vmatpush1.msra.mxu0 %v381_v58  ;;  %v864_v11 = vsub.f32 %v862_v4, %v863_v8  ;;  %v871_v14 = vand.u32 4294901760, %v870_v12 }
  0x82   : > { %v377_v6 = vand.u32 4294901760, %v376_v3  ;;  %687 = vmatprep.subr.mxu0 %v295_v53 }
  0x83   : > { %v865_v13 = vand.u32 4294901760, %v864_v11 }
  0x84   : > { %378 = vmatprep.subr.mxu1 %v377_v6 }
  0x85   : > { %384 = vmatpush1.msra.mxu1 %v383_v5 }
  0x86   : > { %2949 = vmatmul.mubr.msk.f32.vlgmr.msra.gmra.mrb[0].mxu1 %vm287_vm2, %v3263_v9  ;;  %2950 = vmatmul.mubr.msk.f32.vlgmr.msra.gmra.mrb[0].mxu0 %vm287_vm2, %v3263_v9 }
  0x87   : > { %457 = vmatprep.subr.mxu1 %v374_v57  ;;  %523 = vmatprep.mubr.f32.mxu1 %v3261_v1 }
  0x88   : > { %460 = vmatpush1.msra.mxu1 %v380_v54  ;;  %689 = vmatpush1.msra.mxu0 %v297_v50 }
  0x89   : > { %752 = vmatprep.mubr.f32.mxu0 %v3261_v1  ;;  %784 = vmatprep.subr.mxu1 %v783_v59 }
  0x8e   : > { %526 = vmatmul.mubr.f32.vlgmr.msra.gmra.mrb[0].mxu1 %v3463_v43  ;;  %2951 = vmatmul.mubr.msk.f32.vlgmr.msra.gmra.mrb[0].mxu0 %vm287_vm2, %v3263_v9 }
  0x8f   : > { %786 = vmatpush1.msra.mxu1 %v785_v63  ;;  %849 = vmatprep.mubr.f32.mxu1 %v3261_v1 }
  0x90   : > { %866 = vmatprep.subr.mxu1 %v865_v13  ;;  %1342 = vmatprep.mubr.f32.mxu0 %v3261_v1 }
  0x92   : > { %855 = vmatmul.mubr.f32.vlgmr.msra.gmra.mrb[2].mxu1 %v3481_v55 }
  0x93   : > { %872 = vmatpush1.msra.mxu1 %v871_v14  ;;  %935 = vmatprep.mubr.f32.mxu1 %v3261_v1 }
  0x94   : > { %945 = vmatprep.subr.mxu1 %v862_v4 }
  0x9a   : > { %2952 = vmatmul.mubr.msk.f32.vlgmr.msra.gmra.mrb[2].mxu1 %vm287_vm2, %v3263_v9 }
  0x9b   : > { %948 = vmatpush1.msra.mxu1 %v868_v7  ;;  %1011 = vmatprep.mubr.f32.mxu1 %v3261_v1 }
  0x9c   : > { %1021 = vmatprep.subr.mxu1 %v783_v59 }
  0xa2   : > { %1014 = vmatmul.mubr.f32.vlgmr.msra.gmra.mrb[2].mxu1 %v3463_v43 }
  0xa3   : > { %1023 = vmatpush1.msra.mxu1 %v785_v63  ;;  %1086 = vmatprep.mubr.f32.mxu1 %v3261_v1 }
  0xa4   : > { %1099 = vmatprep.subr.mxu1 %v863_v8 }
  0xaa   : > { %1090 = vmatmul.mubr.f32.vlgmr.msra.gmra.mrb[2].mxu1 %v3466_v44 }
  0xab   : > { %1103 = vmatpush1.msra.mxu1 %v869_v10  ;;  %1166 = vmatprep.mubr.f32.mxu1 %v3261_v1 }
  0xac   : > { %1175 = vmatprep.subr.mxu1 %v783_v59 }
  0xb2   : > { %2953 = vmatmul.mubr.msk.f32.vlgmr.msra.gmra.mrb[2].mxu1 %vm287_vm2, %v3263_v9 }
  0xb3   : > { %1177 = vmatpush1.msra.mxu1 %v785_v63  ;;  %1240 = vmatprep.mubr.f32.mxu1 %v3261_v1 }
  0xba   : > { %2954 = vmatmul.mubr.msk.f32.vlgmr.msra.gmra.mrb[2].mxu1 %vm287_vm2, %v3263_v9 }
  0xbb   : > { %1813 = vmatprep.mubr.f32.mxu1 %v3261_v1 }
 0x161   : > { %v527_v15 = vpop.f32.mrb[0].mxu1  ;;  %v755_v16 = vpop.f32.mrb[0].mxu0 }
 0x162   : > { %v2972_v17 = vadd.f32 %v755_v16, %v527_v15  ;;  %v529_v18 = vpop.f32.mrb[1].mxu1  ;;  %v757_v19 = vpop.f32.mrb[1].mxu0 }
 0x163   : > { %v2973_v20 = vadd.f32 %v757_v19, %v529_v18 }
 0x164   : > { %3099 = vrcp.f32 %v2972_v17 }
 0x165   : > { %3101 = vrcp.f32 %v2973_v20 }
 0x16e   : > { %v3100_v23 = vpop.eup %3099 }
 0x16f   : > { %v3102_v24 = vpop.eup %3101  ;;  %v767_v25 = vrot.slane %v3100_v23, %v3520_v22 }
 0x170   : > { %v771_v26 = vrot.slane %v3102_v24, %v3520_v22 }
 0x172   : > { %v774_v27 = vcombine.low %v767_v25, %v771_v26 }
 0x174   : > { %v776_v28 = vmul.f32 %v3468_v45, %v774_v27 }
 0x176   : > { %v2955_v29 = vadd.f32 -0.25, %v776_v28 }
 0x178   : > { %v2736_v30 = vcombine.high %v2955_v29, %v2955_v29  ;;  %v1267_v31 = vmul.f32 %v2955_v29, %v2955_v29  ;;  %v2738_v32 = vsel %vm239_vm1, %v2955_v29, 0.0 }
 0x17a   : > { %v2739_v0 = vsel %vm239_vm1, %v2736_v30, 0.0  ;;  %v1742_v33 = vcombine.high %v1267_v31, %v1267_v31  ;;  %v1743_v34 = vsel %vm239_vm1, %v1267_v31, 0  ;;  %v2756_v37 = vsel %vm239_vm1, %v1267_v31, 0.0 }
 0x17b   : > { %v2740_v35 = vadd.f32 %v2739_v0, %v2738_v32  ;;  %v1749_v36 = vand.u32 4294901760, %v1743_v34 }
 0x17c   : > { %v2757_v38 = vsel %vm239_vm1, %v1742_v33, 0.0  ;;  %v1745_v39 = vsel %vm239_vm1, %v1742_v33, 0 }
 0x17d   : > { %2741 = vadd.xlane.f32.xlu0 %v2740_v35  ;;  %v2758_v40 = vadd.f32 %v2757_v38, %v2756_v37  ;;  %v1747_v41 = vand.u32 4294901760, %v1745_v39  ;;  %v1832_v42 = vsub.f32 %v1743_v34, %v1749_v36 }
 0x17f   : > { %2759 = vadd.xlane.f32.xlu1 %v2758_v40  ;;  %v1826_v45 = vsub.f32 %v1745_v39, %v1747_v41  ;;  %1748 = vmatprep.subr.mxu1 %v1747_v41  ;;  %v1833_v46 = vand.u32 4294901760, %v1832_v42 }
 0x180   : > { %1750 = vmatpush1.msra.mxu1 %v1749_v36 }
 0x181   : > { %1819 = vmatmul.mubr.f32.vlgmr.msra.gmra.mrb[4].mxu1 %v3481_v55  ;;  %v1827_v48 = vand.u32 4294901760, %v1826_v45  ;;  %v1834_v49 = vsub.f32 %v1832_v42, %v1833_v46 }
 0x182   : > { %1899 = vmatprep.mubr.f32.mxu1 %v3261_v1 }
 0x183   : > { %v1828_v50 = vsub.f32 %v1826_v45, %v1827_v48  ;;  %v1835_v52 = vand.u32 4294901760, %v1834_v49 }
 0x185   : > { %v1829_v51 = vand.u32 4294901760, %v1828_v50 }
 0x187   : > { %1830 = vmatprep.subr.mxu1 %v1829_v51  ;;  %v3264_v51 = vmov 1966171168  }
 0x188   : > { %1836 = vmatpush1.msra.mxu1 %v1835_v52  ;;  %v2696_v52 = vunpack.c.l.s4 %v3264_v51 }
 0x189   : > { %2960 = vmatmul.mubr.msk.f32.vlgmr.msra.gmra.mrb[4].mxu1 %vm287_vm2, %v3263_v9  ;;  %1909 = vmatprep.subr.mxu1 %v1826_v45 }
 0x18a   : > { %1912 = vmatpush1.msra.mxu1 %v1832_v42  ;;  %1975 = vmatprep.mubr.f32.mxu1 %v3261_v1 }
 0x18b   : > { %1985 = vmatprep.subr.mxu1 %v1747_v41 }
 0x18d   : > { %v1243_v53 = vpop.f32.mrb[2].mxu1 }
 0x18e   : > { %3103 = vrcp.f32 %v1243_v53  ;;  %v1245_v54 = vpop.f32.mrb[3].mxu1  ;;  %v2697_v53 = vunpack.c.0.s8 %v2696_v52 }
 0x18f   : > { %3105 = vrcp.f32 %v1245_v54 }
 0x191   : > { %1978 = vmatmul.mubr.f32.vlgmr.msra.gmra.mrb[4].mxu1 %v3463_v43 }
 0x192   : > { %1987 = vmatpush1.msra.mxu1 %v1749_v36  ;;  %2050 = vmatprep.mubr.f32.mxu1 %v3261_v1 }
 0x193   : > { %2063 = vmatprep.subr.mxu1 %v1827_v48 }
 0x198   : > { %v3104_v56 = vpop.eup %3103 }
 0x199   : > { %v3106_v57 = vpop.eup %3105  ;;  %v1255_v58 = vrot.slane %v3104_v56, %v3520_v22  ;;  %2054 = vmatmul.mubr.f32.vlgmr.msra.gmra.mrb[4].mxu1 %v3466_v44 }
 0x19a   : > { %v1259_v59 = vrot.slane %v3106_v57, %v3520_v22  ;;  %2067 = vmatpush1.msra.mxu1 %v1833_v46  ;;  %2130 = vmatprep.mubr.f32.mxu1 %v3261_v1 }
 0x19b   : > { %2139 = vmatprep.subr.mxu1 %v1747_v41 }
 0x19c   : > { %v1262_v60 = vcombine.low %v1255_v58, %v1259_v59 }
 0x19e   : > { %v1264_v61 = vmul.f32 %v3472_v47, %v1262_v60  ;;  %v2691_v60 = vld [vmem:[#allocation2] sm:$0x3] }
 0x1a0   : > { %v2956_v62 = vadd.f32 -0.25, %v1264_v61 }
 0x1a1   : > { %2961 = vmatmul.mubr.msk.f32.vlgmr.msra.gmra.mrb[4].mxu1 %vm287_vm2, %v3263_v9 }
 0x1a2   : > { %2141 = vmatpush1.msra.mxu1 %v1749_v36  ;;  %v2745_v63 = vcombine.high %v2956_v62, %v2956_v62  ;;  %v1269_v3 = vmul.f32 %v2956_v62, %v2955_v29  ;;  %v1268_v4 = vmul.f32 %v2956_v62, %v2956_v62  ;;  %2204 = vmatprep.mubr.f32.mxu1 %v3261_v1  ;;  %v2747_v5 = vsel %vm239_vm1, %v2956_v62, 0.0 }
 0x1a4   : > { %v2748_v6 = vsel %vm239_vm1, %v2745_v63, 0.0  ;;  %v1271_v7 = vcombine.high %v1269_v3, %v1269_v3  ;;  %v2213_v8 = vcombine.high %v1268_v4, %v1268_v4  ;;  %v1272_v11 = vsel %vm239_vm1, %v1269_v3, 0 }
 0x1a5   : > { %v2749_v10 = vadd.f32 %v2748_v6, %v2747_v5  ;;  %v2765_v12 = vsel %vm239_vm1, %v1268_v4, 0.0  ;;  %v1278_v14 = vand.u32 4294901760, %v1272_v11  ;;  %v2774_v20 = vsel %vm239_vm1, %v1269_v3, 0.0 }
 0x1a6   : > { %v1274_v47 = vsel %vm239_vm1, %v1271_v7, 0  ;;  %v2766_v13 = vsel %vm239_vm1, %v2213_v8, 0.0  ;;  %v2775_v18 = vsel %vm239_vm1, %v1271_v7, 0.0  ;;  %v2216_v30 = vsel %vm239_vm1, %v2213_v8, 0 }
 0x1a7   : > { %2750 = vadd.xlane.f32.xlu0 %v2749_v10  ;;  %v1276_v15 = vand.u32 4294901760, %v1274_v47  ;;  %v2767_v16 = vadd.f32 %v2766_v13, %v2765_v12  ;;  %v1361_v17 = vsub.f32 %v1272_v11, %v1278_v14  ;;  %v2776_v24 = vadd.f32 %v2775_v18, %v2774_v20 }
 0x1a8   : > { %v2218_v31 = vand.u32 4294901760, %v2216_v30  ;;  %v2214_v32 = vsel %vm239_vm1, %v1268_v4, 0  ;;  %v2787_v63 = vsub.s32 1, %v3517_v21 }
 0x1a9   : > { %1277 = vmatprep.subr.mxu0 %v1276_v15  ;;  %2768 = vadd.xlane.f32.xlu1 %v2767_v16  ;;  %v1355_v19 = vsub.f32 %v1274_v47, %v1276_v15  ;;  %v1362_v23 = vand.u32 4294901760, %v1361_v17  ;;  %v2220_v0 = vand.u32 4294901760, %v2214_v32 }
 0x1aa   : > { %1279 = vmatpush1.msra.mxu0 %v1278_v14  ;;  %2962 = vmatmul.mubr.msk.f32.vlgmr.msra.gmra.mrb[4].mxu1 %vm287_vm2, %v3263_v9  ;;  %v2297_v33 = vsub.f32 %v2216_v30, %v2218_v31 }
 0x1ab   : > { %1348 = vmatmul.mubr.f32.vlgmr.msra.gmra.mrb[2].mxu0 %v3481_v55  ;;  %v1356_v25 = vand.u32 4294901760, %v1355_v19  ;;  %v1363_v26 = vsub.f32 %v1361_v17, %v1362_v23  ;;  %v2303_v34 = vsub.f32 %v2214_v32, %v2220_v0 }
 0x1ac   : > { %1428 = vmatprep.mubr.f32.mxu0 %v3261_v1  ;;  %v2298_v35 = vand.u32 4294901760, %v2297_v33 }
 0x1ad   : > { %2777 = vadd.xlane.f32.xlu1 %v2776_v24  ;;  %v1357_v27 = vsub.f32 %v1355_v19, %v1356_v25  ;;  %v1364_v29 = vand.u32 4294901760, %v1363_v26  ;;  %v2304_v36 = vand.u32 4294901760, %v2303_v34 }
 0x1ae   : > { %v2299_v37 = vsub.f32 %v2297_v33, %v2298_v35 }
 0x1af   : > { %v1358_v28 = vand.u32 4294901760, %v1357_v27  ;;  %v2305_v38 = vsub.f32 %v2303_v34, %v2304_v36 }
 0x1b0   : > { %v2300_v39 = vand.u32 4294901760, %v2299_v37 }
 0x1b1   : > { %1359 = vmatprep.subr.mxu0 %v1358_v28  ;;  %v2306_v40 = vand.u32 4294901760, %v2305_v38 }
 0x1b2   : > { %1365 = vmatpush1.msra.mxu0 %v1364_v29 }
 0x1b3   : > { %2957 = vmatmul.mubr.msk.f32.vlgmr.msra.gmra.mrb[2].mxu0 %vm287_vm2, %v3263_v9  ;;  %1438 = vmatprep.subr.mxu0 %v1355_v19 }
 0x1b4   : > { %1441 = vmatpush1.msra.mxu0 %v1361_v17  ;;  %1504 = vmatprep.mubr.f32.mxu0 %v3261_v1 }
 0x1b5   : > { %1514 = vmatprep.subr.mxu0 %v1276_v15 }
 0x1bb   : > { %1507 = vmatmul.mubr.f32.vlgmr.msra.gmra.mrb[2].mxu0 %v3463_v43 }
 0x1bc   : > { %1516 = vmatpush1.msra.mxu0 %v1278_v14  ;;  %1579 = vmatprep.mubr.f32.mxu0 %v3261_v1 }
 0x1bd   : > { %1592 = vmatprep.subr.mxu0 %v1356_v25 }
 0x1c3   : > { %1583 = vmatmul.mubr.f32.vlgmr.msra.gmra.mrb[2].mxu0 %v3466_v44 }
 0x1c4   : > { %1596 = vmatpush1.msra.mxu0 %v1362_v23  ;;  %1659 = vmatprep.mubr.f32.mxu0 %v3261_v1 }
 0x1c5   : > { %1668 = vmatprep.subr.mxu0 %v1276_v15 }
 0x1cb   : > { %2958 = vmatmul.mubr.msk.f32.vlgmr.msra.gmra.mrb[2].mxu0 %vm287_vm2, %v3263_v9 }
 0x1cc   : > { %1670 = vmatpush1.msra.mxu0 %v1278_v14  ;;  %1733 = vmatprep.mubr.f32.mxu0 %v3261_v1 }
 0x1cd   : > { %2219 = vmatprep.subr.mxu0 %v2218_v31 }
 0x1d3   : > { %2959 = vmatmul.mubr.msk.f32.vlgmr.msra.gmra.mrb[2].mxu0 %vm287_vm2, %v3263_v9 }
 0x1d4   : > { %2221 = vmatpush1.msra.mxu0 %v2220_v0  ;;  %2284 = vmatprep.mubr.f32.mxu0 %v3261_v1 }
 0x1d5   : > { %2301 = vmatprep.subr.mxu0 %v2300_v39 }
 0x1d7   : > { %2290 = vmatmul.mubr.f32.vlgmr.msra.gmra.mrb[4].mxu0 %v3481_v55 }
 0x1d8   : > { %2307 = vmatpush1.msra.mxu0 %v2306_v40  ;;  %2370 = vmatprep.mubr.f32.mxu0 %v3261_v1 }
 0x1d9   : > { %2380 = vmatprep.subr.mxu0 %v2297_v33 }
 0x1df   : > { %2963 = vmatmul.mubr.msk.f32.vlgmr.msra.gmra.mrb[4].mxu0 %vm287_vm2, %v3263_v9 }
 0x1e0   : > { %2383 = vmatpush1.msra.mxu0 %v2303_v34  ;;  %2446 = vmatprep.mubr.f32.mxu0 %v3261_v1 }
 0x1e1   : > { %2456 = vmatprep.subr.mxu0 %v2218_v31 }
 0x1e7   : > { %2449 = vmatmul.mubr.f32.vlgmr.msra.gmra.mrb[4].mxu0 %v3463_v43 }
 0x1e8   : > { %2458 = vmatpush1.msra.mxu0 %v2220_v0  ;;  %2521 = vmatprep.mubr.f32.mxu0 %v3261_v1 }
 0x1e9   : > { %2534 = vmatprep.subr.mxu0 %v2298_v35 }
 0x1ef   : > { %2525 = vmatmul.mubr.f32.vlgmr.msra.gmra.mrb[4].mxu0 %v3466_v44 }
 0x1f0   : > { %2538 = vmatpush1.msra.mxu0 %v2304_v36  ;;  %2601 = vmatprep.mubr.f32.mxu0 %v3261_v1 }
 0x1f1   : > { %2610 = vmatprep.subr.mxu0 %v2218_v31 }
 0x1f7   : > { %2964 = vmatmul.mubr.msk.f32.vlgmr.msra.gmra.mrb[4].mxu0 %vm287_vm2, %v3263_v9 }
 0x1f8   : > { %2612 = vmatpush1.msra.mxu0 %v2220_v0  ;;  %2675 = vmatprep.mubr.f32.mxu0 %v3261_v1 }
 0x1ff   : > { %2965 = vmatmul.mubr.msk.f32.vlgmr.msra.gmra.mrb[4].mxu0 %vm287_vm2, %v3263_v9  ;;  %v2700_v9 = vsub.s32 %v2697_v53, %v3517_v21 }
 0x20a   : > { %v2742_v10 = vpop.xlane.xlu0 %2741 }
 0x20c   : > { %v2760_v11 = vpop.xlane.xlu1 %2759 }
 0x234   : > { %v2751_v47 = vpop.xlane.xlu0 %2750 }
 0x235   : > { %v2802_v2 = vsel %vm2801_vm4, %v2742_v10, %v2751_v47 }
 0x236   : > { %v2769_v12 = vpop.xlane.xlu1 %2768  ;;  %v2804_v13 = vsel %vm2803_vm5, %v2802_v2, %v2760_v11 }
 0x237   : > { %v2806_v15 = vsel %vm2805_vm6, %v2804_v13, %v2769_v12 }
 0x23a   : > { %v2778_v21 = vpop.xlane.xlu1 %2777 }
 0x23b   : > { %v2807_v17 = vsel %vm287_vm2, %v2806_v15, %v2778_v21 }
 0x27d   : > { %v2207_v43 = vpop.f32.mrb[4].mxu1 }
 0x27e   : > { %v2209_v55 = vpop.f32.mrb[5].mxu1 }
 0x2a6   : > { %v1736_v41 = vpop.f32.mrb[2].mxu0 }
 0x2a7   : > { %v1738_v42 = vpop.f32.mrb[3].mxu0 }
 0x2d2   : > { %v2678_v45 = vpop.f32.mrb[4].mxu0 }
 0x2d3   : > { %v2683_v46 = vmul.f32 %v2678_v45, %v2207_v43  ;;  %v2680_v44 = vpop.f32.mrb[5].mxu0 }
 0x2d4   : > { %v2684_v48 = vmul.f32 %v2680_v44, %v2209_v55 }
 0x2d5   : > { %v2685_v49 = vadd.f32 1e-16, %v2683_v46 }
 0x2d6   : > { %v2686_v50 = vadd.f32 1e-16, %v2684_v48 }
 0x2d7   : > { %3107 = vrsqrt.f32 %v2685_v49 }
 0x2d8   : > { %3109 = vrsqrt.f32 %v2686_v50 }
 0x2e1   : > { %v3108_v54 = vpop.eup %3107 }
 0x2e2   : > { %v3110_v1 = vpop.eup %3109  ;;  %v2689_v56 = vmul.f32 %v3108_v54, %v1736_v41 }
 0x2e3   : > { %v2690_v57 = vmul.f32 %v3110_v1, %v1738_v42 }
 0x2e5   : > { %v2694_v58 = vcombine.low %v2689_v56, %v2690_v57 }
 0x2e7   : > { %v2701_v59 = vrot.slane %v2694_v58, %v2700_v9 }
 0x2e9   : > { %v2708_v61 = vrot.slane %v2701_v59, %v2700_v9 }
 0x2eb   : > { %v2710_v62 = vadd.f32 %v2708_v61, %v2691_v60 }
 0x2ed   : > { %2715 = vst.msk [vmem:[#allocation2] sm:$0x3] %vm3451_vm0, %v2710_v62 }
 0x2f4   : > { %v2779_v3 = vld [vmem:[#allocation2] sm:$0x3] }
 0x2f5   : > { %v2784_v4 = vrot.slane %v2779_v3, %v3520_v22  ;;  %v2788_v5 = vrot.slane %v2779_v3, %v2787_v63 }
 0x2f7   : > { %v2792_v6 = vsel %vm2791_vm3, %v2784_v4, 0.0  ;;  %v2793_v7 = vsel %vm2791_vm3, %v2788_v5, 0.0 }
 0x2f8   : > { %v2794_v8 = vadd.f32 %v2793_v7, %v2792_v6 }
 0x2fa   : > { %2795 = vadd.xlane.f32.xlu0 %v2794_v8 }
 0x387   : > { %v2796_v14 = vpop.xlane.xlu0 %2795 }
 0x388   : > { %v2800_v16 = vrot.slane %v2796_v14, %v3520_v22 }
 0x38a   : > { %v2809_v18 = vsel %vm2808_vm7, %v2807_v17, %v2800_v16 }
 0x38b   : > { %v2811_v19 = vsel %vm2810_vm8, %v2809_v18, 0.0 }
 0x38c   : > { %2813 = vst.msk [vmem:[%s217_s19] sm:$0xf] %vm2812_vm9, %v2811_v19 }
 0x38d   : > { %3184 = shalt.err (!%p3181_p2)
}
 0x38e   : > { %s3185_s8 = scalar_lea.hbm %s3599_s28, 64  ;;  %s3189_s4 = scalar_lea.hbm %s3650_s2, 128 }
 0x38f   : > { %p3186_p9 = scmp.ne.s32.totalorder %s3599_s28, %s3185_s8  ;;  %p3190_p6 = scmp.lt.u32.totalorder %s3599_s28, %s3650_s2 }
 0x390   : > { %p3191_p13 = scmp.lt.u32.totalorder %s3189_s4, %s3185_s8  ;;  %p3193_p8 = scmp.lt.u32.totalorder %s3185_s8, %s3599_s28 }
 0x391   : > { %p3187_p11 = pnand %p3186_p9, %p3665_p0 }
 0x392   : > { %p3192_p5 = por %p3191_p13, %p3190_p6 }
 0x393   : > { %p3188_p3 = pneg %p3187_p11 }
 0x394   : > { %p3194_p7 = por %p3193_p8, %p3192_p5 }
 0x396   : > { %p3195_p4 = pnand %p3194_p7, %p3188_p3 }
 0x398   : > { %3198 = shalt.err (!%p3195_p4)
}
 0x399   : > { %3026 = dma.vmem_to_hbm [thread:$0]  (%p3665_p0), %s3601_s30, 64, %s3599_s28, %s2815_s12  }
 0x39a PF: > { %s2840_s16 = sand.u32 1, %s3237_s9   ;;  %p3666_p10 = scmp.ne.s32.totalorder %s3656_s24, 0 }
 0x39b   : > { %p3667_p12 = scmp.ge.s32.totalorder %s3257_s14, 2  ;;  %s2841_s21 = scalar_lea.sflag [#allocation10], %s2840_s16 }
 0x39d   : > { %p3036_p1 = pnand %p3667_p12, %p3666_p10 }
 0x39f   : > { %3232 = dma.done.wait (!%p3036_p1), %s2841_s21, 64  }
 0x3a0   : > { %3234 = vsyncadd (!%p3036_p1), %s2841_s21, 4294967232  ;;  %s21_s14 = sadd.s32 1, %s3257_s14   ;;  %s3668_s9 = smov %s3241_s10 }
 0x3a1   : > { %p18_p2 = scmp.ge.s32.totalorder %s21_s14, 4   ;;  %s3669_s10 = smov %s3245_s11 }
 0x3a2   : > { %s3670_s11 = smov %s3337_s23  ;;  %s3671_s12 = smov %s3253_s13 }
 0x3a3   : > { %s3672_s13 = smov %s3674_s17  ;;  %20 = sbr.rel (!%p18_p2) target bundleno = 8 (0x8), region = 94 }
 0x3aa   :  { %2846 = vsyncpa [#allocation9], 1 }
 0x3ab   :  { %2848 = vsyncpa [#allocation9 + $0x1], 1 }
 0x3ac   :  { %2849 = vsyncpa [#allocation12], 1 }
 0x3ad   :  { %2851 = vsyncpa [#allocation12 + $0x1], 1 }
 0x3ae   :  { %2852 = vsyncpa [#allocation10], 1 }
 0x3af   :  { %2854 = vsyncpa [#allocation10 + $0x1], 1 }

</bundles_post_ra>
